<compile_context>
chip_gen: v5e
topology: v5e:2x2
jax: 0.10.0
libtpu: 0.0.40
codegen_flags: <defaults>
</compile_context>

<pallas_src>
import functools

import jax
import jax.numpy as jnp
from jax import lax
from jax.experimental import pallas as pl
from jax.experimental.pallas import tpu as pltpu


_FUSED_BLOCK_BUDGET = 512 * 1024       # max bytes of x per grid step (fused path)
_TILE_BLOCK_BUDGET = 2 * 1024 * 1024   # max bytes of x per grid step (tiled path)
_VMEM_LIMIT = 32 * 1024 * 1024         # safe scoped-VMEM limit on v5e/v6e/v7x


# --------------------------------------------------------------------------
# Fused single-pass kernel (small per-batch slabs): pool + MLP + multiply.
# x block: (NB, C, HW)  -- channels on sublanes, spatial on lanes.
# --------------------------------------------------------------------------
def _fused_kernel(x_ref, w1_ref, b1_ref, w2_ref, b2_ref, o_ref, *, inv_hw):
    # Global average pool == lane reduction; accumulate in f32.
    mean = jnp.sum(x_ref[...].astype(jnp.float32), axis=2) * inv_hw      # (NB, C)
    # Conv1x1 -> ReLU -> Conv1x1 -> Sigmoid, batched over NB rows.
    h = jnp.dot(mean, w1_ref[...], preferred_element_type=jnp.float32) + b1_ref[...]
    h = jnp.maximum(h, 0.0)
    a = jnp.dot(h, w2_ref[...], preferred_element_type=jnp.float32) + b2_ref[...]
    attn = jax.nn.sigmoid(a)                                             # (NB, C)
    # Re-read x from the VMEM ref (instead of keeping the whole tile live
    # across both uses) to bound vreg pressure; broadcast attn over lanes.
    o_ref[...] = (x_ref[...] * attn[:, :, None]).astype(o_ref.dtype)


def _fused_call(x, w1, b1, w2, b2, nb):
    n, c, hw = x.shape
    cr = w1.shape[1]
    itemsize = x.dtype.itemsize
    kernel = functools.partial(_fused_kernel, inv_hw=1.0 / hw)
    return pl.pallas_call(
        kernel,
        out_shape=jax.ShapeDtypeStruct((n, c, hw), x.dtype),
        grid_spec=pltpu.PrefetchScalarGridSpec(
            num_scalar_prefetch=0,
            grid=(pl.cdiv(n, nb),),
            in_specs=[
                pl.BlockSpec((nb, c, hw), lambda i: (i, 0, 0)),
                pl.BlockSpec((c, cr), lambda i: (0, 0)),
                pl.BlockSpec((1, cr), lambda i: (0, 0)),
                pl.BlockSpec((cr, c), lambda i: (0, 0)),
                pl.BlockSpec((1, c), lambda i: (0, 0)),
            ],
            out_specs=pl.BlockSpec((nb, c, hw), lambda i: (i, 0, 0)),
        ),
        compiler_params=pltpu.CompilerParams(
            dimension_semantics=("parallel",),
            vmem_limit_bytes=_VMEM_LIMIT,
        ),
        cost_estimate=pl.CostEstimate(
            flops=2 * n * c * hw + 4 * n * c * cr,
            transcendentals=n * c,
            bytes_accessed=2 * n * c * hw * itemsize + 2 * c * cr * 4,
        ),
    )(x, w1, b1, w2, b2)


# --------------------------------------------------------------------------
# Tiled path, pass 1: pool over HW tiles (scratch accumulator) + MLP finalize.
# grid = (batch blocks [parallel], HW tiles [arbitrary, reduction axis last]).
# --------------------------------------------------------------------------
def _pool_mlp_kernel(x_ref, w1_ref, b1_ref, w2_ref, b2_ref, attn_ref, acc_ref,
                     *, hw, tile_hw):
    t = pl.program_id(1)

    @pl.when(t == 0)
    def _init():
        acc_ref[...] = jnp.zeros_like(acc_ref)

    x = x_ref[...].astype(jnp.float32)                       # (NB, C, TH)
    if hw % tile_hw != 0:
        # Mask spatial positions past the true extent in the partial last tile.
        col = lax.broadcasted_iota(jnp.int32, x.shape, 2) + t * tile_hw
        x = jnp.where(col < hw, x, 0.0)
    acc_ref[...] += jnp.sum(x, axis=2)                        # (NB, C)

    @pl.when(t == pl.num_programs(1) - 1)
    def _finalize():
        mean = acc_ref[...] * (1.0 / hw)                      # (NB, C)
        h = jnp.dot(mean, w1_ref[...], preferred_element_type=jnp.float32) + b1_ref[...]
        h = jnp.maximum(h, 0.0)
        a = jnp.dot(h, w2_ref[...], preferred_element_type=jnp.float32) + b2_ref[...]
        attn_ref[...] = jax.nn.sigmoid(a)[:, :, None].astype(attn_ref.dtype)


def _pool_mlp_call(x, w1, b1, w2, b2, nb, tile_hw):
    n, c, hw = x.shape
    cr = w1.shape[1]
    itemsize = x.dtype.itemsize
    kernel = functools.partial(_pool_mlp_kernel, hw=hw, tile_hw=tile_hw)
    return pl.pallas_call(
        kernel,
        out_shape=jax.ShapeDtypeStruct((n, c, 1), jnp.float32),
        grid_spec=pltpu.PrefetchScalarGridSpec(
            num_scalar_prefetch=0,
            grid=(pl.cdiv(n, nb), pl.cdiv(hw, tile_hw)),
            in_specs=[
                pl.BlockSpec((nb, c, tile_hw), lambda i, t: (i, 0, t)),
                pl.BlockSpec((c, cr), lambda i, t: (0, 0)),
                pl.BlockSpec((1, cr), lambda i, t: (0, 0)),
                pl.BlockSpec((cr, c), lambda i, t: (0, 0)),
                pl.BlockSpec((1, c), lambda i, t: (0, 0)),
            ],
            out_specs=pl.BlockSpec((nb, c, 1), lambda i, t: (i, 0, 0)),
            scratch_shapes=[pltpu.VMEM((nb, c), jnp.float32)],
        ),
        compiler_params=pltpu.CompilerParams(
            dimension_semantics=("parallel", "arbitrary"),
            vmem_limit_bytes=_VMEM_LIMIT,
        ),
        cost_estimate=pl.CostEstimate(
            flops=n * c * hw + 4 * n * c * cr,
            transcendentals=n * c,
            bytes_accessed=n * c * hw * itemsize + n * c * 4,
        ),
    )(x, w1, b1, w2, b2)


# --------------------------------------------------------------------------
# Tiled path, pass 2: out = x * attn (per-channel scalar broadcast over lanes).
# Fully parallel elementwise streaming pass.
# --------------------------------------------------------------------------
def _apply_kernel(x_ref, attn_ref, o_ref):
    o_ref[...] = (x_ref[...] * attn_ref[...]).astype(o_ref.dtype)


def _apply_call(x, attn, nb, tile_hw):
    n, c, hw = x.shape
    itemsize = x.dtype.itemsize
    return pl.pallas_call(
        _apply_kernel,
        out_shape=jax.ShapeDtypeStruct((n, c, hw), x.dtype),
        grid_spec=pltpu.PrefetchScalarGridSpec(
            num_scalar_prefetch=0,
            grid=(pl.cdiv(n, nb), pl.cdiv(hw, tile_hw)),
            in_specs=[
                pl.BlockSpec((nb, c, tile_hw), lambda i, t: (i, 0, t)),
                pl.BlockSpec((nb, c, 1), lambda i, t: (i, 0, 0)),
            ],
            out_specs=pl.BlockSpec((nb, c, tile_hw), lambda i, t: (i, 0, t)),
        ),
        compiler_params=pltpu.CompilerParams(
            dimension_semantics=("parallel", "parallel"),
            vmem_limit_bytes=_VMEM_LIMIT,
        ),
        cost_estimate=pl.CostEstimate(
            flops=n * c * hw,
            transcendentals=0,
            bytes_accessed=2 * n * c * hw * itemsize + n * c * 4,
        ),
    )(x, attn)


def _choose_tiles(n, c, hw, itemsize, budget):
    """Largest legal (multiple-of-128 or full-extent) HW tile + batch block
    that keeps one x block within `budget` bytes."""
    if hw * c * itemsize <= budget:
        tile_hw = hw                                   # full extent: always legal
    else:
        t = max(128, min(2048, (budget // (c * itemsize)) // 128 * 128))
        tile_hw = min(hw, t)
    nb = max(1, min(n, budget // max(1, c * tile_hw * itemsize)))
    return nb, tile_hw


def channel_attention(x_nchw, w1, b1, w2, b2, *, force_tiled=False):
    """x_nchw: (N, C, H, W).  w1: (C, Cr), b1: (1, Cr), w2: (Cr, C), b2: (1, C).

    w1/w2 are the PyTorch Conv2d 1x1 weights with spatial dims squeezed and
    transposed so the pooled-vector matmul is `pooled @ w`.
    """
    n, c, h, w = x_nchw.shape
    hw = h * w
    x = x_nchw.reshape(n, c, hw)          # free: no data movement, NCHW kept
    itemsize = x.dtype.itemsize
    slab = c * hw * itemsize              # bytes of one batch row of x

    if (not force_tiled) and slab <= _FUSED_BLOCK_BUDGET:
        nb = max(1, min(n, _FUSED_BLOCK_BUDGET // slab))
        out = _fused_call(x, w1, b1, w2, b2, nb)
    else:
        nb, tile_hw = _choose_tiles(n, c, hw, itemsize, _TILE_BLOCK_BUDGET)
        attn = _pool_mlp_call(x, w1, b1, w2, b2, nb, tile_hw)   # (N, C, 1) f32
        out = _apply_call(x, attn, nb, tile_hw)

    return out.reshape(n, c, h, w)


if __name__ == "__main__":
    # Module defaults: in_channel=128, ratio=16 -> hidden = 8.
    N, C, H, W = 2, 128, 8, 8
    ratio = 16
    Cr = C // ratio

    key = jax.random.PRNGKey(0)
    k = jax.random.split(key, 5)

    x = jax.random.normal(k[0], (N, C, H, W), dtype=jnp.float32)

    # Deterministic synthetic params (Conv2d(C,Cr,1): weight (Cr,C,1,1), bias (Cr,)),
    # stored transposed/squeezed for the channel matmul formulation.
    w1 = jax.random.normal(k[1], (C, Cr), dtype=jnp.float32) * 0.1
    b1 = jax.random.normal(k[2], (1, Cr), dtype=jnp.float32) * 0.1
    w2 = jax.random.normal(k[3], (Cr, C), dtype=jnp.float32) * 0.1
    b2 = jax.random.normal(k[4], (1, C), dtype=jnp.float32) * 0.1

    # Fused single-pass path (selected automatically for this small slab).
    out_fused = jax.block_until_ready(channel_attention(x, w1, b1, w2, b2))
    # Tiled reduce-then-apply path (the large-shape path), forced for coverage.
    out_tiled = jax.block_until_ready(
        channel_attention(x, w1, b1, w2, b2, force_tiled=True))

    # Pure-JAX reference.
    mean = jnp.mean(x, axis=(2, 3))                         # (N, C)
    h = jnp.maximum(mean @ w1 + b1, 0.0)                    # (N, Cr)
    attn = jax.nn.sigmoid(h @ w2 + b2)                      # (N, C)
    ref = x * attn[:, :, None, None]

    assert jnp.allclose(out_fused, ref, atol=1e-5, rtol=1e-5), "fused path mismatch"
    assert jnp.allclose(out_tiled, ref, atol=1e-5, rtol=1e-5), "tiled path mismatch"

    print("KERNEL_OK")
</pallas_src>

<mosaic_0001>
module attributes {stable_mosaic.version = 11 : i64} {
  func.func @_fused_kernel(%arg0: i32, %arg1: memref<2x128x64xf32, #tpu.memory_space<vmem>>, %arg2: memref<128x8xf32, #tpu.memory_space<vmem>>, %arg3: memref<1x8xf32, #tpu.memory_space<vmem>>, %arg4: memref<8x128xf32, #tpu.memory_space<vmem>>, %arg5: memref<1x128xf32, #tpu.memory_space<vmem>>, %arg6: memref<2x128x64xf32, #tpu.memory_space<vmem>>) attributes {dimension_semantics = [#tpu.dimension_semantics<parallel>], iteration_bounds = array<i64: 1>, scalar_prefetch = 0 : i64, scratch_operands = 0 : i64, tpu.core_type = #tpu.core_type<tc>, window_params = [{transform_indices = @transform_0, window_bounds = array<i64: 2, 128, 64>}, {pipeline_mode = #tpu.pipeline_mode<synchronous>, transform_indices = @transform_1, window_bounds = array<i64: 128, 8>}, {pipeline_mode = #tpu.pipeline_mode<synchronous>, transform_indices = @transform_2, window_bounds = array<i64: 1, 8>}, {pipeline_mode = #tpu.pipeline_mode<synchronous>, transform_indices = @transform_3, window_bounds = array<i64: 8, 128>}, {pipeline_mode = #tpu.pipeline_mode<synchronous>, transform_indices = @transform_4, window_bounds = array<i64: 1, 128>}, {transform_indices = @transform_5, window_bounds = array<i64: 2, 128, 64>}]} {
    %c0 = arith.constant 0 : index
    %c0_0 = arith.constant 0 : index
    %c0_1 = arith.constant 0 : index
    %0 = vector.load %arg1[%c0, %c0_0, %c0_1] : memref<2x128x64xf32, #tpu.memory_space<vmem>>, vector<2x128x64xf32>
    %cst = arith.constant dense<0.000000e+00> : vector<2x128xf32>
    %1 = vector.multi_reduction <add>, %0, %cst [2] : vector<2x128x64xf32> to vector<2x128xf32>
    %cst_2 = arith.constant 1.562500e-02 : f32
    %2 = vector.broadcast %cst_2 : f32 to vector<2x128xf32>
    %3 = arith.mulf %1, %2 : vector<2x128xf32>
    %c0_3 = arith.constant 0 : index
    %c0_4 = arith.constant 0 : index
    %4 = vector.load %arg2[%c0_3, %c0_4] : memref<128x8xf32, #tpu.memory_space<vmem>>, vector<128x8xf32>
    %cst_5 = arith.constant dense<0.000000e+00> : vector<2x8xf32>
    %5 = tpu.matmul %3, %4, %cst_5 {dimension_numbers = #tpu.dot_dimension_numbers<[1], [0], [0], [1], [0, 0, 1, 1], [], []>} : vector<2x128xf32>, vector<128x8xf32>, vector<2x8xf32> -> vector<2x8xf32>
    %c0_6 = arith.constant 0 : index
    %c0_7 = arith.constant 0 : index
    %6 = vector.load %arg3[%c0_6, %c0_7] : memref<1x8xf32, #tpu.memory_space<vmem>>, vector<1x8xf32>
    %7 = vector.broadcast %6 : vector<1x8xf32> to vector<2x8xf32>
    %8 = arith.addf %5, %7 : vector<2x8xf32>
    %cst_8 = arith.constant 0.000000e+00 : f32
    %9 = vector.broadcast %cst_8 : f32 to vector<2x8xf32>
    %10 = arith.maximumf %8, %9 : vector<2x8xf32>
    %c0_9 = arith.constant 0 : index
    %c0_10 = arith.constant 0 : index
    %11 = vector.load %arg4[%c0_9, %c0_10] : memref<8x128xf32, #tpu.memory_space<vmem>>, vector<8x128xf32>
    %cst_11 = arith.constant dense<0.000000e+00> : vector<2x128xf32>
    %12 = tpu.matmul %10, %11, %cst_11 {dimension_numbers = #tpu.dot_dimension_numbers<[1], [0], [0], [1], [0, 0, 1, 1], [], []>} : vector<2x8xf32>, vector<8x128xf32>, vector<2x128xf32> -> vector<2x128xf32>
    %c0_12 = arith.constant 0 : index
    %c0_13 = arith.constant 0 : index
    %13 = vector.load %arg5[%c0_12, %c0_13] : memref<1x128xf32, #tpu.memory_space<vmem>>, vector<1x128xf32>
    %14 = vector.broadcast %13 : vector<1x128xf32> to vector<2x128xf32>
    %15 = arith.addf %12, %14 : vector<2x128xf32>
    %16 = arith.negf %15 : vector<2x128xf32>
    %17 = math.exp %16 : vector<2x128xf32>
    %cst_14 = arith.constant 1.000000e+00 : f32
    %18 = vector.broadcast %cst_14 : f32 to vector<2x128xf32>
    %19 = arith.addf %18, %17 : vector<2x128xf32>
    %20 = arith.divf %18, %19 : vector<2x128xf32>
    %c0_15 = arith.constant 0 : index
    %c0_16 = arith.constant 0 : index
    %c0_17 = arith.constant 0 : index
    %21 = vector.load %arg1[%c0_15, %c0_16, %c0_17] : memref<2x128x64xf32, #tpu.memory_space<vmem>>, vector<2x128x64xf32>
    %22 = vector.shape_cast %20 : vector<2x128xf32> to vector<2x128x1xf32>
    %23 = vector.broadcast %22 : vector<2x128x1xf32> to vector<2x128x64xf32>
    %24 = arith.mulf %21, %23 : vector<2x128x64xf32>
    %c0_18 = arith.constant 0 : index
    %c0_19 = arith.constant 0 : index
    %c0_20 = arith.constant 0 : index
    %25 = vector.load %arg6[%c0_18, %c0_19, %c0_20] : memref<2x128x64xf32, #tpu.memory_space<vmem>>, vector<2x128x64xf32>
    tpu.vector_store %arg6[%c0_18, %c0_19, %c0_20], %24 {strides = array<i32>} : memref<2x128x64xf32, #tpu.memory_space<vmem>>, vector<2x128x64xf32>,
    return
  }
  func.func @transform_0(%arg0: i32) -> (i32, i32, i32) {
    %c0_i32 = arith.constant 0 : i32
    %c0_i32_0 = arith.constant 0 : i32
    %c0_i32_1 = arith.constant 0 : i32
    return %arg0, %c0_i32, %c0_i32_0 : i32, i32, i32
  }
  func.func @transform_1(%arg0: i32) -> (i32, i32) {
    %c0_i32 = arith.constant 0 : i32
    %c0_i32_0 = arith.constant 0 : i32
    %c0_i32_1 = arith.constant 0 : i32
    return %c0_i32, %c0_i32_0 : i32, i32
  }
  func.func @transform_2(%arg0: i32) -> (i32, i32) {
    %c0_i32 = arith.constant 0 : i32
    %c0_i32_0 = arith.constant 0 : i32
    %c0_i32_1 = arith.constant 0 : i32
    return %c0_i32, %c0_i32_0 : i32, i32
  }
  func.func @transform_3(%arg0: i32) -> (i32, i32) {
    %c0_i32 = arith.constant 0 : i32
    %c0_i32_0 = arith.constant 0 : i32
    %c0_i32_1 = arith.constant 0 : i32
    return %c0_i32, %c0_i32_0 : i32, i32
  }
  func.func @transform_4(%arg0: i32) -> (i32, i32) {
    %c0_i32 = arith.constant 0 : i32
    %c0_i32_0 = arith.constant 0 : i32
    %c0_i32_1 = arith.constant 0 : i32
    return %c0_i32, %c0_i32_0 : i32, i32
  }
  func.func @transform_5(%arg0: i32) -> (i32, i32, i32) {
    %c0_i32 = arith.constant 0 : i32
    %c0_i32_0 = arith.constant 0 : i32
    %c0_i32_1 = arith.constant 0 : i32
    return %arg0, %c0_i32, %c0_i32_0 : i32, i32, i32
  }
}

</mosaic_0001>

<bundles_post_ra>
// kernel: tpu_custom_call.1
= control target key start
LH: loop header
LB: loop body
LE: loop exit
PB: predicated region body
PF: predicated region fallthrough
CT: control target
= control target key end

     0   :  { %vm52_vm0 = vcmask 523264   ;;  %vm238_vm1 = vcmask 130112   ;;  %vm242_vm2 = vcmask 195712   ;;  %vm246_vm3 = vcmask 261312   ;;  %s1326_s0 = inlined_call_operand.vmem [shape: f32[2,128,64], index: 0, kind: input, shape index: {}]   ;;  %s1327_s2 = inlined_call_operand.vmem [shape: f32[1,8], index: 2, kind: input, shape index: {}]   ;;  %s1328_s1 = inlined_call_operand.vmem [shape: f32[128,8], index: 1, kind: input, shape index: {}]   ;;  %s1329_s4 = inlined_call_operand.vmem [shape: f32[1,128], index: 4, kind: input, shape index: {}]   ;;  %s1330_s3 = inlined_call_operand.vmem [shape: f32[8,128], index: 3, kind: input, shape index: {}]   ;;  %s1331_s5 = inlined_call_operand.vmem [shape: f32[2,128,64], index: 5, kind: output, shape index: {}]  }
   0x1   :  { %v735_v0 = vld [vmem:[%s1326_s0 + $0x80] sm:$0xff]  ;;  %v745_v2 = vld [vmem:[%s1326_s0 + $0x10] sm:$0xff]  ;;  %v756_v6 = vld [vmem:[%s1326_s0 + $0x88] sm:$0xff]  ;;  %vm250_vm4 = vcmask 326912   ;;  %vm254_vm5 = vcmask 392512   ;;  %vm258_vm6 = vcmask 458112  }
   0x2   :  { %v740_v1 = vld [vmem:[%s1326_s0] sm:$0xff]  ;;  %v101_v3 = vsel %vm52_vm0, %v735_v0, 0.0  ;;  %v59_v5 = vsel %vm52_vm0, %v745_v2, 0.0  ;;  %v761_v7 = vld [vmem:[%s1326_s0 + $0x8] sm:$0xff]  ;;  %v766_v8 = vld [vmem:[%s1326_s0 + $0x90] sm:$0xff]  ;;  %v104_v9 = vsel %vm52_vm0, %v756_v6, 0.0 }
   0x3   :  { %v53_v4 = vsel %vm52_vm0, %v740_v1, 0.0  ;;  %102 = vadd.xlane.f32.xlu1 %v101_v3  ;;  %60 = vadd.xlane.f32.xlu2 %v59_v5  ;;  %v56_v10 = vsel %vm52_vm0, %v761_v7, 0.0  ;;  %v107_v11 = vsel %vm52_vm0, %v766_v8, 0.0  ;;  %v777_v12 = vld [vmem:[%s1326_s0 + $0x98] sm:$0xff]  ;;  %v787_v14 = vld [vmem:[%s1326_s0 + $0x20] sm:$0xff]  ;;  %v798_v18 = vld [vmem:[%s1326_s0 + $0x28] sm:$0xff] }
   0x4   :  { %54 = vadd.xlane.f32.xlu0 %v53_v4  ;;  %v782_v13 = vld [vmem:[%s1326_s0 + $0x18] sm:$0xff]  ;;  %v110_v15 = vsel %vm52_vm0, %v777_v12, 0.0  ;;  %v65_v17 = vsel %vm52_vm0, %v787_v14, 0.0  ;;  %v803_v19 = vld [vmem:[%s1326_s0 + $0xa0] sm:$0xff]  ;;  %v808_v20 = vld [vmem:[%s1326_s0 + $0xa8] sm:$0xff]  ;;  %v68_v21 = vsel %vm52_vm0, %v798_v18, 0.0 }
   0x5   :  { %v62_v16 = vsel %vm52_vm0, %v782_v13, 0.0  ;;  %1343 = vst [vmem:[#allocation2_spill] sm:$0xff] %v803_v19  ;;  %v113_v22 = vsel %vm52_vm0, %v803_v19, 0.0  ;;  %v116_v23 = vsel %vm52_vm0, %v808_v20, 0.0  ;;  %v819_v24 = vld [vmem:[%s1326_s0 + $0xb0] sm:$0xff]  ;;  %v829_v26 = vld [vmem:[%s1326_s0 + $0x38] sm:$0xff] }
   0x6   :  { %1344 = vst [vmem:[#allocation3_spill] sm:$0xff] %v808_v20  ;;  %v824_v25 = vld [vmem:[%s1326_s0 + $0x30] sm:$0xff]  ;;  %v119_v27 = vsel %vm52_vm0, %v819_v24, 0.0  ;;  %v74_v29 = vsel %vm52_vm0, %v829_v26, 0.0  ;;  %v840_v30 = vld [vmem:[%s1326_s0 + $0x40] sm:$0xff]  ;;  %v845_v31 = vld [vmem:[%s1326_s0 + $0xb8] sm:$0xff] }
   0x7   :  { %1345 = vst [vmem:[#allocation4_spill] sm:$0xff] %v819_v24  ;;  %v71_v28 = vsel %vm52_vm0, %v824_v25, 0.0  ;;  %v850_v32 = vld [vmem:[%s1326_s0 + $0xc0] sm:$0xff]  ;;  %v77_v33 = vsel %vm52_vm0, %v840_v30, 0.0  ;;  %v122_v34 = vsel %vm52_vm0, %v845_v31, 0.0  ;;  %v861_v36 = vld [vmem:[%s1326_s0 + $0xc8] sm:$0xff] }
   0x8   :  { %1346 = vst [vmem:[#allocation5_spill] sm:$0xff] %v850_v32  ;;  %v125_v35 = vsel %vm52_vm0, %v850_v32, 0.0  ;;  %v866_v37 = vld [vmem:[%s1326_s0 + $0x48] sm:$0xff]  ;;  %v871_v38 = vld [vmem:[%s1326_s0 + $0x50] sm:$0xff]  ;;  %v128_v39 = vsel %vm52_vm0, %v861_v36, 0.0  ;;  %v882_v42 = vld [vmem:[%s1326_s0 + $0x58] sm:$0xff] }
   0x9   :  { %1347 = vst [vmem:[#allocation6_spill] sm:$0xff] %v861_v36  ;;  %v80_v40 = vsel %vm52_vm0, %v866_v37, 0.0  ;;  %v83_v41 = vsel %vm52_vm0, %v871_v38, 0.0  ;;  %v887_v43 = vld [vmem:[%s1326_s0 + $0xd0] sm:$0xff]  ;;  %v892_v44 = vld [vmem:[%s1326_s0 + $0xd8] sm:$0xff]  ;;  %v86_v45 = vsel %vm52_vm0, %v882_v42, 0.0 }
   0xa   :  { %1348 = vst [vmem:[#allocation7_spill] sm:$0xff] %v887_v43  ;;  %v131_v46 = vsel %vm52_vm0, %v887_v43, 0.0  ;;  %v134_v47 = vsel %vm52_vm0, %v892_v44, 0.0  ;;  %v903_v48 = vld [vmem:[%s1326_s0 + $0xe0] sm:$0xff]  ;;  %v913_v50 = vld [vmem:[%s1326_s0 + $0x68] sm:$0xff]  ;;  %v924_v54 = vld [vmem:[%s1326_s0 + $0x70] sm:$0xff] }
   0xb   :  { %105 = vadd.xlane.f32.xlu1 %v104_v9  ;;  %108 = vadd.xlane.f32.xlu2 %v107_v11  ;;  %1349 = vst [vmem:[#allocation8_spill] sm:$0xff] %v892_v44  ;;  %v908_v49 = vld [vmem:[%s1326_s0 + $0x60] sm:$0xff]  ;;  %v137_v51 = vsel %vm52_vm0, %v903_v48, 0.0  ;;  %v92_v53 = vsel %vm52_vm0, %v913_v50, 0.0  ;;  %v929_v55 = vld [vmem:[%s1326_s0 + $0xe8] sm:$0xff]  ;;  %v934_v56 = vld [vmem:[%s1326_s0 + $0xf0] sm:$0xff] }
   0xc   :  { %57 = vadd.xlane.f32.xlu0 %v56_v10  ;;  %v89_v52 = vsel %vm52_vm0, %v908_v49, 0.0  ;;  %1350 = vst [vmem:[#allocation9_spill] sm:$0xff] %v929_v55  ;;  %v95_v57 = vsel %vm52_vm0, %v924_v54, 0.0  ;;  %v140_v58 = vsel %vm52_vm0, %v929_v55, 0.0  ;;  %v143_v59 = vsel %vm52_vm0, %v934_v56, 0.0  ;;  %v945_v60 = vld [vmem:[%s1326_s0 + $0xf8] sm:$0xff] }
   0xd   :  { %1351 = vst [vmem:[#allocation10_spill] sm:$0xff] %v934_v56  ;;  %v950_v61 = vld [vmem:[%s1326_s0 + $0x78] sm:$0xff]  ;;  %v146_v62 = vsel %vm52_vm0, %v945_v60, 0.0  ;;  %vm262_vm7 = vcmask 523712   ;;  %vm266_vm8 = vcmask 589312   ;;  %vm270_vm9 = vcmask 654912  }
   0xe   :  { %1352 = vst [vmem:[#allocation11_spill] sm:$0xff] %v945_v60  ;;  %v98_v63 = vsel %vm52_vm0, %v950_v61, 0.0  ;;  %vm274_vm10 = vcmask 720512   ;;  %vm278_vm11 = vcmask 786112   ;;  %vm282_vm12 = vcmask 851712  }
   0xf   :  { %vm286_vm13 = vcmask 917312   ;;  %vm290_vm14 = vcmask 982912   ;;  %vm294_vm15 = vcmask 1048512  }
  0x13   :  { %111 = vadd.xlane.f32.xlu1 %v110_v15  ;;  %66 = vadd.xlane.f32.xlu2 %v65_v17 }
  0x14   :  { %63 = vadd.xlane.f32.xlu0 %v62_v16 }
  0x1b   :  { %69 = vadd.xlane.f32.xlu1 %v68_v21  ;;  %117 = vadd.xlane.f32.xlu2 %v116_v23  ;;  %v196_v21 = vld [vmem:[%s1328_s1 + $0x78] sm:$0xff] }
  0x1c   :  { %114 = vadd.xlane.f32.xlu0 %v113_v22  ;;  %330 = vmatpush.msra.mxu0 %v196_v21 }
  0x23   :  { %120 = vadd.xlane.f32.xlu1 %v119_v27  ;;  %75 = vadd.xlane.f32.xlu2 %v74_v29  ;;  %v194_v29 = vld [vmem:[%s1328_s1 + $0x68] sm:$0xff] }
  0x24   :  { %72 = vadd.xlane.f32.xlu0 %v71_v28  ;;  %v195_v28 = vld [vmem:[%s1328_s1 + $0x70] sm:$0xff] }
  0x25   :  { %331 = vmatpush.msra.mxu0 %v195_v28 }
  0x27   :  { %332 = vmatpush.msra.mxu0 %v194_v29 }
  0x2b   :  { %78 = vadd.xlane.f32.xlu1 %v77_v33  ;;  %126 = vadd.xlane.f32.xlu2 %v125_v35  ;;  %v193_v33 = vld [vmem:[%s1328_s1 + $0x60] sm:$0xff] }
  0x2c   :  { %123 = vadd.xlane.f32.xlu0 %v122_v34  ;;  %333 = vmatpush.msra.mxu0 %v193_v33  ;;  %v192_v34 = vld [vmem:[%s1328_s1 + $0x58] sm:$0xff] }
  0x2e   :  { %334 = vmatpush.msra.mxu0 %v192_v34  ;;  %v183_v34 = vld [vmem:[%s1328_s1 + $0x10] sm:$0xff] }
  0x33   :  { %129 = vadd.xlane.f32.xlu1 %v128_v39  ;;  %84 = vadd.xlane.f32.xlu2 %v83_v41  ;;  %v191_v41 = vld [vmem:[%s1328_s1 + $0x50] sm:$0xff] }
  0x34   :  { %81 = vadd.xlane.f32.xlu0 %v80_v40  ;;  %335 = vmatpush.msra.mxu0 %v191_v41 }
  0x3b   :  { %87 = vadd.xlane.f32.xlu1 %v86_v45  ;;  %135 = vadd.xlane.f32.xlu2 %v134_v47  ;;  %v190_v45 = vld [vmem:[%s1328_s1 + $0x48] sm:$0xff]  ;;  %v188_v47 = vld [vmem:[%s1328_s1 + $0x38] sm:$0xff] }
  0x3c   :  { %132 = vadd.xlane.f32.xlu0 %v131_v46  ;;  %336 = vmatpush.msra.mxu0 %v190_v45  ;;  %v189_v46 = vld [vmem:[%s1328_s1 + $0x40] sm:$0xff] }
  0x3e   :  { %337 = vmatpush.msra.mxu0 %v189_v46 }
  0x40   :  { %338 = vmatpush.msra.mxu0 %v188_v47  ;;  %v182_v47 = vld [vmem:[%s1328_s1 + $0x8] sm:$0xff] }
  0x43   :  { %138 = vadd.xlane.f32.xlu1 %v137_v51  ;;  %93 = vadd.xlane.f32.xlu2 %v92_v53 }
  0x44   :  { %90 = vadd.xlane.f32.xlu0 %v89_v52 }
  0x4b   :  { %96 = vadd.xlane.f32.xlu1 %v95_v57  ;;  %144 = vadd.xlane.f32.xlu2 %v143_v59  ;;  %v187_v57 = vld [vmem:[%s1328_s1 + $0x30] sm:$0xff]  ;;  %v1332_v59 = vlaneseq }
  0x4c   :  { %141 = vadd.xlane.f32.xlu0 %v140_v58  ;;  %339 = vmatpush.msra.mxu0 %v187_v57  ;;  %v186_v58 = vld [vmem:[%s1328_s1 + $0x28] sm:$0xff]  ;;  %v181_v57 = vld [vmem:[%s1328_s1] sm:$0xff] }
  0x4d   :  { %v1018_v21 = vand.u32 127, %v1332_v59 }
  0x4e   :  { %340 = vmatpush.msra.mxu0 %v186_v58 }
  0x4f   :  { %v236_v41 = vadd.s32 4294967288, %v1018_v21  ;;  %v248_v55 = vadd.s32 4294967264, %v1018_v21 }
  0x53   :  { %147 = vadd.xlane.f32.xlu1 %v146_v62  ;;  %v185_v62 = vld [vmem:[%s1328_s1 + $0x20] sm:$0xff] }
  0x54   :  { %99 = vadd.xlane.f32.xlu0 %v98_v63  ;;  %v184_v63 = vld [vmem:[%s1328_s1 + $0x18] sm:$0xff]  ;;  %341 = vmatpush.msra.mxu0 %v185_v62 }
  0x56   :  { %342 = vmatpush.msra.mxu0 %v184_v63  ;;  %v240_v63 = vadd.s32 4294967280, %v1018_v21 }
  0x58   :  { %343 = vmatpush.msra.mxu0 %v183_v34 }
  0x5a   :  { %344 = vmatpush.msra.mxu0 %v182_v47 }
  0x5c   :  { %345 = vmatpush.msra.mxu0 %v181_v57  ;;  %v260_v57 = vadd.s32 4294967240, %v1018_v21 }
  0x76   :  { %v103_v3 = vpop.xlane.xlu1 %102  ;;  %v956_v5 = vpop.xlane.xlu2 %60 }
  0x77   :  { %v55_v4 = vpop.xlane.xlu0 %54  ;;  %v165_v58 = vmul.f32 0.015625, %v103_v3 }
  0x78   :  { %v149_v62 = vmul.f32 0.015625, %v55_v4  ;;  %v151_v4 = vmul.f32 0.015625, %v956_v5 }
  0x79   :  { %v296_v3 = vperm.slane %v165_v58, %v1018_v21 }
  0x7a   :  { %v241_v32 = vperm.slane %v151_v4, %v240_v63 }
  0x7e   :  { %v106_v9 = vpop.xlane.xlu1 %105  ;;  %v109_v11 = vpop.xlane.xlu2 %108 }
  0x7f   :  { %v58_v10 = vpop.xlane.xlu0 %57  ;;  %v166_v45 = vmul.f32 0.015625, %v106_v9  ;;  %v167_v60 = vmul.f32 0.015625, %v109_v11  ;;  %v244_v9 = vadd.s32 4294967272, %v1018_v21  ;;  %v235_v11 = vperm.slane %v149_v62, %v1018_v21 }
  0x80   :  { %v150_v46 = vmul.f32 0.015625, %v58_v10 }
  0x81   :  { %v297_v59 = vperm.slane %v166_v45, %v236_v41  ;;  %v252_v45 = vadd.s32 4294967256, %v1018_v21 }
  0x82   :  { %v237_v10 = vperm.slane %v150_v46, %v236_v41  ;;  %v256_v41 = vadd.s32 4294967248, %v1018_v21 }
  0x84   :  { %v239_v5 = vsel %vm238_vm1, %v237_v10, %v235_v11 }
  0x85   :  { %v243_v10 = vsel %vm242_vm2, %v241_v32, %v239_v5 }
  0x86   :  { %v958_v15 = vpop.xlane.xlu1 %111  ;;  %v960_v17 = vpop.xlane.xlu2 %66 }
  0x87   :  { %v64_v16 = vpop.xlane.xlu0 %63  ;;  %v168_v34 = vmul.f32 0.015625, %v958_v15  ;;  %v298_v15 = vsel %vm238_vm1, %v297_v59, %v296_v3  ;;  %v153_v36 = vmul.f32 0.015625, %v960_v17  ;;  %vm327_vm1 = vcmask 1041409  }
  0x88   :  { %v152_v56 = vmul.f32 0.015625, %v64_v16  ;;  %v299_v16 = vperm.slane %v167_v60, %v240_v63  ;;  %v264_v60 = vadd.s32 4294967232, %v1018_v21 }
  0x89   :  { %v301_v58 = vperm.slane %v168_v34, %v244_v9  ;;  %v249_v63 = vperm.slane %v153_v36, %v248_v55 }
  0x8a   :  { %v300_v3 = vsel %vm242_vm2, %v299_v16, %v298_v15  ;;  %vm356_vm2 = vcmask 64512  }
  0x8b   :  { %v302_v17 = vsel %vm246_vm3, %v301_v58, %v300_v3 }
  0x8e   :  { %v965_v22 = vpop.xlane.xlu1 %69  ;;  %v967_v27 = vpop.xlane.xlu2 %117 }
  0x8f   :  { %v115_v23 = vpop.xlane.xlu0 %114  ;;  %v154_v62 = vmul.f32 0.015625, %v965_v22  ;;  %v170_v20 = vmul.f32 0.015625, %v967_v27  ;;  %v268_v27 = vadd.s32 4294967224, %v1018_v21 }
  0x90   :  { %v169_v47 = vmul.f32 0.015625, %v115_v23  ;;  %v245_v23 = vperm.slane %v152_v56, %v244_v9 }
  0x91   :  { %v305_v9 = vperm.slane %v170_v20, %v252_v45  ;;  %v272_v20 = vadd.s32 4294967216, %v1018_v21 }
  0x92   :  { %v303_v24 = vperm.slane %v169_v47, %v248_v55  ;;  %v247_v22 = vsel %vm246_vm3, %v245_v23, %v243_v10 }
  0x96   :  { %v981_v35 = vpop.xlane.xlu1 %120  ;;  %v985_v40 = vpop.xlane.xlu2 %75 }
  0x97   :  { %v983_v39 = vpop.xlane.xlu0 %72  ;;  %v171_v19 = vmul.f32 0.015625, %v981_v35  ;;  %v253_v35 = vperm.slane %v154_v62, %v252_v45  ;;  %v156_v34 = vmul.f32 0.015625, %v985_v40 }
  0x98   :  { %v155_v59 = vmul.f32 0.015625, %v983_v39  ;;  %v304_v39 = vsel %vm250_vm4, %v303_v24, %v302_v17  ;;  %v251_v24 = vsel %vm250_vm4, %v249_v63, %v247_v22  ;;  %v280_v17 = vadd.s32 4294967200, %v1018_v21 }
  0x99   :  { %v307_v11 = vperm.slane %v171_v19, %v256_v41  ;;  %v255_v19 = vsel %vm254_vm5, %v253_v35, %v251_v24  ;;  %v306_v45 = vsel %vm254_vm5, %v305_v9, %v304_v39 }
  0x9a   :  { %v257_v32 = vperm.slane %v155_v59, %v256_v41 }
  0x9b   :  { %v308_v41 = vsel %vm258_vm6, %v307_v11, %v306_v45 }
  0x9c   :  { %v259_v58 = vsel %vm258_vm6, %v257_v32, %v255_v19  ;;  %v288_v32 = vadd.s32 4294967184, %v1018_v21 }
  0x9e   :  { %v999_v51 = vpop.xlane.xlu1 %78  ;;  %v1003_v53 = vpop.xlane.xlu2 %126 }
  0x9f   :  { %v1001_v52 = vpop.xlane.xlu0 %123  ;;  %v157_v15 = vmul.f32 0.015625, %v999_v51  ;;  %v261_v51 = vperm.slane %v156_v34, %v260_v57 }
  0xa0   :  { %v172_v56 = vmul.f32 0.015625, %v1001_v52  ;;  %v173_v52 = vmul.f32 0.015625, %v1003_v53  ;;  %v276_v53 = vadd.s32 4294967208, %v1018_v21 }
  0xa2   :  { %v309_v5 = vperm.slane %v172_v56, %v260_v57  ;;  %v311_v23 = vperm.slane %v173_v52, %v264_v60  ;;  %v263_v57 = vsel %vm262_vm7, %v261_v51, %v259_v58 }
  0xa6   :  { %v1020_v28 = vpop.xlane.xlu1 %129  ;;  %v1024_v33 = vpop.xlane.xlu2 %84 }
  0xa7   :  { %v1022_v29 = vpop.xlane.xlu0 %81  ;;  %v174_v36 = vmul.f32 0.015625, %v1020_v28  ;;  %v265_v28 = vperm.slane %v157_v15, %v264_v60  ;;  %v159_v3 = vmul.f32 0.015625, %v1024_v33 }
  0xa8   :  { %v158_v55 = vmul.f32 0.015625, %v1022_v29  ;;  %v310_v29 = vsel %vm262_vm7, %v309_v5, %v308_v41  ;;  %v292_v41 = vadd.s32 4294967176, %v1018_v21 }
  0xa9   :  { %v313_v62 = vperm.slane %v174_v36, %v268_v27  ;;  %v267_v60 = vsel %vm266_vm8, %v265_v28, %v263_v57  ;;  %v312_v9 = vsel %vm266_vm8, %v311_v23, %v310_v29  ;;  %v273_v11 = vperm.slane %v159_v3, %v272_v20 }
  0xaa   :  { %v269_v59 = vperm.slane %v158_v55, %v268_v27  ;;  %v284_v27 = vadd.s32 4294967192, %v1018_v21 }
  0xae   :  { %v88_v44 = vpop.xlane.xlu1 %87  ;;  %v136_v46 = vpop.xlane.xlu2 %135 }
  0xaf   :  { %v133_v43 = vpop.xlane.xlu0 %132  ;;  %v176_v56 = vmul.f32 0.015625, %v136_v46  ;;  %v271_v46 = vsel %vm270_vm9, %v269_v59, %v267_v60 }
  0xb0   :  { %v175_v40 = vmul.f32 0.015625, %v133_v43  ;;  %v160_v43 = vmul.f32 0.015625, %v88_v44  ;;  %v314_v44 = vsel %vm270_vm9, %v313_v62, %v312_v9  ;;  %v275_v19 = vsel %vm274_vm10, %v273_v11, %v271_v46  ;;  %v697_v11 = vld [vmem:[%s1329_s4] ss:$0 sm:$0xff] }
  0xb2   :  { %v315_v10 = vperm.slane %v175_v40, %v272_v20  ;;  %v277_v15 = vperm.slane %v160_v43, %v276_v53 }
  0xb4   :  { %v279_v45 = vsel %vm278_vm11, %v277_v15, %v275_v19 }
  0xb6   :  { %v139_v4 = vpop.xlane.xlu1 %138  ;;  %v94_v16 = vpop.xlane.xlu2 %93 }
  0xb7   :  { %v91_v47 = vpop.xlane.xlu0 %90  ;;  %v177_v22 = vmul.f32 0.015625, %v139_v4  ;;  %v316_v4 = vsel %vm274_vm10, %v315_v10, %v314_v44  ;;  %v162_v52 = vmul.f32 0.015625, %v94_v16 }
  0xb8   :  { %v161_v63 = vmul.f32 0.015625, %v91_v47  ;;  %v317_v47 = vperm.slane %v176_v56, %v276_v53 }
  0xb9   :  { %v319_v5 = vperm.slane %v177_v22, %v280_v17  ;;  %v285_v51 = vperm.slane %v162_v52, %v284_v27 }
  0xba   :  { %v281_v36 = vperm.slane %v161_v63, %v280_v17  ;;  %v318_v20 = vsel %vm278_vm11, %v317_v47, %v316_v4 }
  0xbb   :  { %v320_v58 = vsel %vm282_vm12, %v319_v5, %v318_v20 }
  0xbc   :  { %v283_v28 = vsel %vm282_vm12, %v281_v36, %v279_v45 }
  0xbd   :  { %v287_v43 = vsel %vm286_vm13, %v285_v51, %v283_v28 }
  0xbe   :  { %v97_v35 = vpop.xlane.xlu1 %96  ;;  %v145_v33 = vpop.xlane.xlu2 %144 }
  0xbf   :  { %v142_v39 = vpop.xlane.xlu0 %141  ;;  %v163_v55 = vmul.f32 0.015625, %v97_v35  ;;  %v179_v24 = vmul.f32 0.015625, %v145_v33  ;;  %v351_v35 = vld [vmem:[%s1330_s3] sm:$0xff] }
  0xc0   :  { %v178_v34 = vmul.f32 0.015625, %v142_v39  ;;  %375 = vmatpush.msra.mxu1 %v351_v35  ;;  %v696_v39 = vld [vmem:[%s1327_s2] ss:$0 sm:$0xff] }
  0xc1   :  { %v289_v53 = vperm.slane %v163_v55, %v288_v32  ;;  %v323_v16 = vperm.slane %v179_v24, %v288_v32 }
  0xc2   :  { %v321_v40 = vperm.slane %v178_v34, %v284_v27  ;;  %v1353_v34 = vlaneseq }
  0xc3   :  { %v291_v57 = vsel %vm290_vm14, %v289_v53, %v287_v43 }
  0xc4   :  { %v322_v62 = vsel %vm286_vm13, %v321_v40, %v320_v58  ;;  %v1097_v33 = vshrl.u32 %v1353_v34, 7 }
  0xc5   :  { %v324_v17 = vsel %vm290_vm14, %v323_v16, %v322_v62 }
  0xc6   :  { %v148_v23 = vpop.xlane.xlu1 %147  ;;  %663 = vset.pattern.permute.xlu2 %v1097_v33  ;;  %v414_v44 = vadd.s32 16, %v1097_v33  ;;  %v1102_v46 = vadd.s32 8, %v1097_v33  ;;  %v1109_v28 = vadd.s32 40, %v1097_v33  ;;  %v1112_v53 = vadd.s32 64, %v1097_v33 }
  0xc7   :  { %v100_v29 = vpop.xlane.xlu0 %99  ;;  %v180_v59 = vmul.f32 0.015625, %v148_v23  ;;  %v1115_v16 = vadd.s32 24, %v1097_v33  ;;  %v444_v23 = vadd.s32 56, %v1097_v33  ;;  %v426_v62 = vadd.s32 32, %v1097_v33 }
  0xc8   :  { %v164_v3 = vmul.f32 0.015625, %v100_v29  ;;  %665 = vset.pattern.permute.xlu1 %v414_v44  ;;  %664 = vset.pattern.permute.xlu0 %v1102_v46  ;;  %v1122_v29 = vadd.s32 104, %v1097_v33 }
  0xc9   :  { %v325_v10 = vperm.slane %v180_v59, %v292_v41  ;;  %v1127_v59 = vadd.s32 80, %v1097_v33 }
  0xca   :  { %v293_v56 = vperm.slane %v164_v3, %v292_v41  ;;  %v438_v3 = vadd.s32 48, %v1097_v33 }
  0xcb   :  { %v326_v22 = vsel %vm294_vm15, %v325_v10, %v324_v17  ;;  %v474_v10 = vadd.s32 96, %v1097_v33  ;;  %v468_v17 = vadd.s32 88, %v1097_v33 }
  0xcc   :  { %v295_v21 = vsel %vm294_vm15, %v293_v56, %v291_v57  ;;  %v456_v56 = vadd.s32 72, %v1097_v33  ;;  %v1138_v57 = vadd.s32 120, %v1097_v33 }
  0xcd   :  { %v328_v63 = vsel %vm327_vm1, %v326_v22, %v295_v21  ;;  %v486_v21 = vadd.s32 112, %v1097_v33 }
  0xce   :  { %346 = vmatmul.f32.vlgmr.msra.gmra.mxu0 %v328_v63 }
 0x14b   :  { %v347_v60 = vpop.f32.mrf.mxu0 }
 0x14c   :  { %v348_v9 = vadd.f32 %v696_v39, %v347_v60 }
 0x14e   :  { %v350_v27 = vmax.f32 %v348_v9, 0.0 }
 0x150   :  { %661 = vmatmul.msk.f32.vlgmr.msra.gmra.mxu1 %vm356_vm2, %v350_v27 }
 0x1cd   :  { %v377_v32 = vpop.f32.mrf.mxu1 }
 0x1ce   :  { %v378_v15 = vadd.f32 %v697_v11, %v377_v32 }
 0x1d0   :  { %v662_v4 = vmul.f32 -1.442695, %v378_v15 }
 0x1d2   :  { %698 = vpow2.f32 %v662_v4 }
 0x1d8   :  { %v699_v47 = vpop.eup %698 }
 0x1d9   :  { %v383_v52 = vadd.f32 1.0, %v699_v47 }
 0x1db   :  { %700 = vrcp.f32 %v383_v52  ;;  %v395_v24 = vand.u32 2147483648, %v383_v52  ;;  %v393_v19 = vand.u32 2147483647, %v383_v52  ;;  %vm389_vm4 = vweird.f32 %v383_v52 }
 0x1dd   :  { %v396_v20 = vor.u32 1.1754944e-38, %v395_v24  ;;  %vm394_vm6 = vcmp.eq.f32.partialorder %v393_v19, 8.507059e+37 }
 0x1e1   :  { %v701_v5 = vpop.eup %700 }
 0x1e2   :  { %v385_v36 = vmul.f32 %v701_v5, %v383_v52  ;;  %vm390_vm3 = vweird.f32 %v701_v5 }
 0x1e3   :  { %vm391_vm5 = vmor %vm389_vm4, %vm390_vm3 }
 0x1e4   :  { %v386_v55 = vsub.f32 1.0, %v385_v36 }
 0x1e6   :  { %v387_v40 = vmul.f32 %v701_v5, %v386_v55 }
 0x1e8   :  { %v388_v45 = vadd.f32 %v701_v5, %v387_v40 }
 0x1ea   :  { %v392_v51 = vsel %vm391_vm5, %v701_v5, %v388_v45 }
 0x1eb   :  { %v397_v41 = vsel %vm394_vm6, %v396_v20, %v392_v51  ;;  %v1354_v51 = vld [vmem:[#allocation2_spill] sm:$0xff] }
 0x1ec   :  { %v399_v58 = vperm.slane %v397_v41, 0  ;;  %v1131_v43 = vperm.slane %v397_v41, 1 }
 0x1ee   :  { %416 = vperm.xlu1 %665, %v399_v58   ;;  %410 = vperm.xlu0 %664, %v399_v58  }
 0x1ef   :  { %404 = vperm.xlu2 %663, %v399_v58  }
 0x1f6   :  { %668 = vset.pattern.permute.xlu1 %v1109_v28  ;;  %671 = vset.pattern.permute.xlu0 %v1112_v53 }
 0x1f7   :  { %666 = vset.pattern.permute.xlu2 %v1115_v16 }
 0x1fe   :  { %434 = vperm.xlu1 %668, %v399_v58   ;;  %452 = vperm.xlu0 %671, %v399_v58  }
 0x1ff   :  { %422 = vperm.xlu2 %666, %v399_v58  }
 0x206   :  { %670 = vset.pattern.permute.xlu1 %v444_v23  ;;  %676 = vset.pattern.permute.xlu0 %v1122_v29 }
 0x207   :  { %667 = vset.pattern.permute.xlu2 %v426_v62 }
 0x20e   :  { %446 = vperm.xlu1 %670, %v399_v58   ;;  %482 = vperm.xlu0 %676, %v399_v58  }
 0x20f   :  { %428 = vperm.xlu2 %667, %v399_v58  }
 0x216   :  { %673 = vset.pattern.permute.xlu1 %v1127_v59  ;;  %681 = vset.pattern.permute.xlu0 %v414_v44 }
 0x217   :  { %669 = vset.pattern.permute.xlu2 %v438_v3 }
 0x21e   :  { %464 = vperm.xlu1 %673, %v399_v58   ;;  %513 = vperm.xlu0 %681, %v1131_v43  }
 0x21f   :  { %440 = vperm.xlu2 %669, %v399_v58  }
 0x226   :  { %675 = vset.pattern.permute.xlu1 %v474_v10  ;;  %686 = vset.pattern.permute.xlu0 %v444_v23 }
 0x227   :  { %672 = vset.pattern.permute.xlu2 %v456_v56 }
 0x22e   :  { %476 = vperm.xlu1 %675, %v399_v58   ;;  %543 = vperm.xlu0 %686, %v1131_v43  }
 0x22f   :  { %458 = vperm.xlu2 %672, %v399_v58  }
 0x236   :  { %678 = vset.pattern.permute.xlu1 %v1138_v57  ;;  %691 = vset.pattern.permute.xlu0 %v474_v10 }
 0x237   :  { %674 = vset.pattern.permute.xlu2 %v468_v17 }
 0x23e   :  { %494 = vperm.xlu1 %678, %v399_v58   ;;  %573 = vperm.xlu0 %691, %v1131_v43  }
 0x23f   :  { %470 = vperm.xlu2 %674, %v399_v58  }
 0x246   :  { %680 = vset.pattern.permute.xlu1 %v1102_v46  ;;  %695 = vset.pattern.permute.xlu0 %v1138_v57 }
 0x247   :  { %677 = vset.pattern.permute.xlu2 %v486_v21 }
 0x249   :  { %v405_v22 = vpop.permute.xlu2 %404 }
 0x24a   :  { %v593_v63 = vmul.f32 %v405_v22, %v740_v1 }
 0x24c   :  { %625 = vst.msk [vmem:[%s1331_s5] sm:$0xff] %vm52_vm0, %v593_v63 }
 0x24e   :  { %507 = vperm.xlu1 %680, %v1131_v43  }
 0x24f   :  { %488 = vperm.xlu2 %677, %v399_v58   ;;  %v1355_v58 = vld [vmem:[#allocation3_spill] sm:$0xff] }
 0x256   :  { %683 = vset.pattern.permute.xlu1 %v426_v62 }
 0x257   :  { %679 = vset.pattern.permute.xlu2 %v1097_v33 }
 0x259   :  { %v423_v35 = vpop.permute.xlu2 %422 }
 0x25a   :  { %v596_v39 = vmul.f32 %v423_v35, %v782_v13  ;;  %v1361_v35 = vld [vmem:[#allocation9_spill] sm:$0xff] }
 0x25c   :  { %628 = vst.msk [vmem:[%s1331_s5 + $0x18] sm:$0xff] %vm52_vm0, %v596_v39 }
 0x25e   :  { %525 = vperm.xlu1 %683, %v1131_v43  }
 0x25f   :  { %501 = vperm.xlu2 %679, %v1131_v43  }
 0x260   :  { %v417_v1 = vpop.permute.xlu1 %416  ;;  %v411_v60 = vpop.permute.xlu0 %410 }
 0x261   :  { %v595_v9 = vmul.f32 %v417_v1, %v745_v2  ;;  %v594_v27 = vmul.f32 %v411_v60, %v761_v7  ;;  %v1362_v60 = vld [vmem:[#allocation10_spill] sm:$0xff] }
 0x263   :  { %627 = vst.msk [vmem:[%s1331_s5 + $0x10] sm:$0xff] %vm52_vm0, %v595_v9 }
 0x264   :  { %626 = vst.msk [vmem:[%s1331_s5 + $0x8] sm:$0xff] %vm52_vm0, %v594_v27 }
 0x266   :  { %685 = vset.pattern.permute.xlu1 %v438_v3  ;;  %v1358_v3 = vld [vmem:[#allocation6_spill] sm:$0xff] }
 0x267   :  { %682 = vset.pattern.permute.xlu2 %v1115_v16 }
 0x269   :  { %v429_v13 = vpop.permute.xlu2 %428 }
 0x26a   :  { %v597_v34 = vmul.f32 %v429_v13, %v787_v14  ;;  %v1363_v13 = vld [vmem:[#allocation11_spill] sm:$0xff] }
 0x26c   :  { %629 = vst.msk [vmem:[%s1331_s5 + $0x20] sm:$0xff] %vm52_vm0, %v597_v34 }
 0x26e   :  { %537 = vperm.xlu1 %685, %v1131_v43  }
 0x26f   :  { %519 = vperm.xlu2 %682, %v1131_v43  }
 0x270   :  { %v435_v2 = vpop.permute.xlu1 %434  ;;  %v453_v7 = vpop.permute.xlu0 %452 }
 0x271   :  { %v598_v33 = vmul.f32 %v435_v2, %v798_v18  ;;  %v601_v44 = vmul.f32 %v453_v7, %v840_v30 }
 0x273   :  { %630 = vst.msk [vmem:[%s1331_s5 + $0x28] sm:$0xff] %vm52_vm0, %v598_v33 }
 0x274   :  { %633 = vst.msk [vmem:[%s1331_s5 + $0x40] sm:$0xff] %vm52_vm0, %v601_v44 }
 0x276   :  { %688 = vset.pattern.permute.xlu1 %v456_v56  ;;  %v1359_v56 = vld [vmem:[#allocation7_spill] sm:$0xff] }
 0x277   :  { %684 = vset.pattern.permute.xlu2 %v1109_v28 }
 0x279   :  { %v441_v14 = vpop.permute.xlu2 %440 }
 0x27a   :  { %v599_v46 = vmul.f32 %v441_v14, %v824_v25 }
 0x27c   :  { %631 = vst.msk [vmem:[%s1331_s5 + $0x30] sm:$0xff] %vm52_vm0, %v599_v46 }
 0x27e   :  { %555 = vperm.xlu1 %688, %v1131_v43  }
 0x27f   :  { %531 = vperm.xlu2 %684, %v1131_v43  }
 0x280   :  { %v447_v18 = vpop.permute.xlu1 %446  ;;  %v483_v30 = vpop.permute.xlu0 %482 }
 0x281   :  { %v600_v11 = vmul.f32 %v447_v18, %v829_v26  ;;  %v606_v32 = vmul.f32 %v483_v30, %v913_v50 }
 0x283   :  { %632 = vst.msk [vmem:[%s1331_s5 + $0x38] sm:$0xff] %vm52_vm0, %v600_v11 }
 0x284   :  { %638 = vst.msk [vmem:[%s1331_s5 + $0x68] sm:$0xff] %vm52_vm0, %v606_v32 }
 0x286   :  { %690 = vset.pattern.permute.xlu1 %v468_v17 }
 0x287   :  { %687 = vset.pattern.permute.xlu2 %v1112_v53  ;;  %v1356_v53 = vld [vmem:[#allocation4_spill] sm:$0xff] }
 0x289   :  { %v459_v25 = vpop.permute.xlu2 %458 }
 0x28a   :  { %v602_v15 = vmul.f32 %v459_v25, %v866_v37 }
 0x28c   :  { %634 = vst.msk [vmem:[%s1331_s5 + $0x48] sm:$0xff] %vm52_vm0, %v602_v15 }
 0x28e   :  { %567 = vperm.xlu1 %690, %v1131_v43  }
 0x28f   :  { %549 = vperm.xlu2 %687, %v1131_v43  }
 0x290   :  { %v465_v26 = vpop.permute.xlu1 %464  ;;  %v514_v50 = vpop.permute.xlu0 %513 }
 0x291   :  { %v603_v4 = vmul.f32 %v465_v26, %v871_v38  ;;  %v611_v47 = vmul.f32 %v514_v50, %v766_v8 }
 0x293   :  { %635 = vst.msk [vmem:[%s1331_s5 + $0x50] sm:$0xff] %vm52_vm0, %v603_v4 }
 0x294   :  { %643 = vst.msk [vmem:[%s1331_s5 + $0x90] sm:$0xff] %vm52_vm0, %v611_v47 }
 0x296   :  { %693 = vset.pattern.permute.xlu1 %v486_v21  ;;  %v1360_v21 = vld [vmem:[#allocation8_spill] sm:$0xff] }
 0x297   :  { %689 = vset.pattern.permute.xlu2 %v1127_v59 }
 0x299   :  { %v471_v37 = vpop.permute.xlu2 %470 }
 0x29a   :  { %v604_v52 = vmul.f32 %v471_v37, %v882_v42 }
 0x29c   :  { %636 = vst.msk [vmem:[%s1331_s5 + $0x58] sm:$0xff] %vm52_vm0, %v604_v52 }
 0x29e   :  { %585 = vperm.xlu1 %693, %v1131_v43  }
 0x29f   :  { %561 = vperm.xlu2 %689, %v1131_v43  }
 0x2a0   :  { %v477_v8 = vpop.permute.xlu1 %476  ;;  %v544_v38 = vpop.permute.xlu0 %543 }
 0x2a1   :  { %v605_v5 = vmul.f32 %v477_v8, %v908_v49  ;;  %v616_v36 = vmul.f32 %v544_v38, %v845_v31 }
 0x2a3   :  { %637 = vst.msk [vmem:[%s1331_s5 + $0x60] sm:$0xff] %vm52_vm0, %v605_v5 }
 0x2a4   :  { %648 = vst.msk [vmem:[%s1331_s5 + $0xb8] sm:$0xff] %vm52_vm0, %v616_v36 }
 0x2a7   :  { %692 = vset.pattern.permute.xlu2 %v1122_v29  ;;  %v1357_v29 = vld [vmem:[#allocation5_spill] sm:$0xff] }
 0x2a9   :  { %v489_v42 = vpop.permute.xlu2 %488 }
 0x2aa   :  { %v607_v55 = vmul.f32 %v489_v42, %v924_v54 }
 0x2ac   :  { %639 = vst.msk [vmem:[%s1331_s5 + $0x70] sm:$0xff] %vm52_vm0, %v607_v55 }
 0x2af   :  { %579 = vperm.xlu2 %692, %v1131_v43  }
 0x2b0   :  { %v495_v31 = vpop.permute.xlu1 %494  ;;  %v574_v49 = vpop.permute.xlu0 %573 }
 0x2b1   :  { %v608_v24 = vmul.f32 %v495_v31, %v950_v61  ;;  %v621_v40 = vmul.f32 %v574_v49, %v903_v48 }
 0x2b3   :  { %640 = vst.msk [vmem:[%s1331_s5 + $0x78] sm:$0xff] %vm52_vm0, %v608_v24 }
 0x2b4   :  { %653 = vst.msk [vmem:[%s1331_s5 + $0xe0] sm:$0xff] %vm52_vm0, %v621_v40 }
 0x2b7   :  { %694 = vset.pattern.permute.xlu2 %v1138_v57 }
 0x2b9   :  { %v502_v54 = vpop.permute.xlu2 %501 }
 0x2ba   :  { %v609_v19 = vmul.f32 %v502_v54, %v735_v0 }
 0x2bc   :  { %641 = vst.msk [vmem:[%s1331_s5 + $0x80] sm:$0xff] %vm52_vm0, %v609_v19 }
 0x2bf   :  { %591 = vperm.xlu2 %694, %v1131_v43  }
 0x2c0   :  { %v508_v48 = vpop.permute.xlu1 %507 }
 0x2c1   :  { %v610_v61 = vmul.f32 %v508_v48, %v756_v6 }
 0x2c3   :  { %642 = vst.msk [vmem:[%s1331_s5 + $0x88] sm:$0xff] %vm52_vm0, %v610_v61 }
 0x2c9   :  { %v520_v45 = vpop.permute.xlu2 %519 }
 0x2ca   :  { %v612_v20 = vmul.f32 %v520_v45, %v777_v12 }
 0x2cc   :  { %644 = vst.msk [vmem:[%s1331_s5 + $0x98] sm:$0xff] %vm52_vm0, %v612_v20 }
 0x2d0   :  { %v526_v0 = vpop.permute.xlu1 %525 }
 0x2d1   :  { %v613_v41 = vmul.f32 %v526_v0, %v1354_v51 }
 0x2d3   :  { %645 = vst.msk [vmem:[%s1331_s5 + $0xa0] sm:$0xff] %vm52_vm0, %v613_v41 }
 0x2d9   :  { %v532_v6 = vpop.permute.xlu2 %531 }
 0x2da   :  { %v614_v28 = vmul.f32 %v532_v6, %v1355_v58 }
 0x2dc   :  { %646 = vst.msk [vmem:[%s1331_s5 + $0xa8] sm:$0xff] %vm52_vm0, %v614_v28 }
 0x2e0   :  { %v538_v12 = vpop.permute.xlu1 %537 }
 0x2e1   :  { %v615_v16 = vmul.f32 %v538_v12, %v1356_v53 }
 0x2e3   :  { %647 = vst.msk [vmem:[%s1331_s5 + $0xb0] sm:$0xff] %vm52_vm0, %v615_v16 }
 0x2e9   :  { %v550_v23 = vpop.permute.xlu2 %549 }
 0x2ea   :  { %v617_v62 = vmul.f32 %v550_v23, %v1357_v29 }
 0x2ec   :  { %649 = vst.msk [vmem:[%s1331_s5 + $0xc0] sm:$0xff] %vm52_vm0, %v617_v62 }
 0x2f0   :  { %v556_v59 = vpop.permute.xlu1 %555 }
 0x2f1   :  { %v618_v43 = vmul.f32 %v556_v59, %v1358_v3 }
 0x2f3   :  { %650 = vst.msk [vmem:[%s1331_s5 + $0xc8] sm:$0xff] %vm52_vm0, %v618_v43 }
 0x2f9   :  { %v562_v10 = vpop.permute.xlu2 %561 }
 0x2fa   :  { %v619_v57 = vmul.f32 %v562_v10, %v1359_v56 }
 0x2fc   :  { %651 = vst.msk [vmem:[%s1331_s5 + $0xd0] sm:$0xff] %vm52_vm0, %v619_v57 }
 0x300   :  { %v568_v17 = vpop.permute.xlu1 %567 }
 0x301   :  { %v620_v22 = vmul.f32 %v568_v17, %v1360_v21 }
 0x303   :  { %652 = vst.msk [vmem:[%s1331_s5 + $0xd8] sm:$0xff] %vm52_vm0, %v620_v22 }
 0x309   :  { %v580_v63 = vpop.permute.xlu2 %579 }
 0x30a   :  { %v622_v39 = vmul.f32 %v580_v63, %v1361_v35 }
 0x30c   :  { %654 = vst.msk [vmem:[%s1331_s5 + $0xe8] sm:$0xff] %vm52_vm0, %v622_v39 }
 0x310   :  { %v586_v1 = vpop.permute.xlu1 %585 }
 0x311   :  { %v623_v9 = vmul.f32 %v586_v1, %v1362_v60 }
 0x313   :  { %655 = vst.msk [vmem:[%s1331_s5 + $0xf0] sm:$0xff] %vm52_vm0, %v623_v9 }
 0x319   :  { %v592_v27 = vpop.permute.xlu2 %591 }
 0x31a   :  { %v624_v34 = vmul.f32 %v592_v27, %v1363_v13 }
 0x31c   :  { %656 = vst.msk [vmem:[%s1331_s5 + $0xf8] sm:$0xff] %vm52_vm0, %v624_v34 }

</bundles_post_ra>
